<compile_context>
chip_gen: v7x
topology: tpu7x:2x2x1
jax: 0.10.0
libtpu: 0.0.40
codegen_flags: <defaults>
</compile_context>

<pallas_src>
import functools

import jax
import jax.numpy as jnp
from jax.experimental import pallas as pl
from jax.experimental.pallas import tpu as pltpu


# --------------------------------------------------------------------------- #
# Kernel
# --------------------------------------------------------------------------- #
def _scl_kernel(x_ref, w_ref, b_ref, mask_ref, str_ref):
    """One grid step == one lane-tile of pooled pixels.

    x_ref    : (C, TP)    pooled features, pixels on the lane axis
    w_ref    : (1+S, C)   fused [maskg | strutureg] 1x1-conv weight
    b_ref    : (1+S, 1)   fused bias column (f32)
    mask_ref : (1, TP)    maskg output  (no trailing ReLU)
    str_ref  : (S, TP)    strutureg output (trailing ReLU)
    """
    r = jnp.maximum(x_ref[...], 0)                            # shared nn.ReLU
    out = jnp.dot(w_ref[...], r, preferred_element_type=jnp.float32)
    out = out + b_ref[...]                                    # (1+S, TP), f32
    mask_ref[...] = out[0:1, :].astype(mask_ref.dtype)        # row 0: maskg
    str_ref[...] = jnp.maximum(out[1:, :], 0.0).astype(str_ref.dtype)


# --------------------------------------------------------------------------- #
# Tiling helpers (VMEM-aware)
# --------------------------------------------------------------------------- #
def _round_up(x, m):
    return -(-x // m) * m


def _vmem_capacity_bytes():
    try:
        cap = getattr(pltpu.get_tpu_info(), "vmem_capacity_bytes", None)
        if cap:
            return int(cap)
    except Exception:
        pass
    return 64 << 20  # conservative fallback (v7x per-core VMEM)


def _choose_tp(m, c, s, itemsize):
    """Largest 128-multiple divisor of `m` whose double-buffered (C,TP) input
    plus (1,TP)+(S,TP) output blocks fit the VMEM budget, capped at the
    measured 2048-lane sweet spot.  Tiny / ragged lane axes use one block."""
    if m <= 128 or m % 128 != 0:
        return m  # tiny or ragged: single full-width block (fits for sane C)
    cap = _vmem_capacity_bytes()
    budget = min(cap // 2, 64 << 20)                  # working-set target
    c_pad = _round_up(max(c, 1), 8)                   # sublane padding
    rows_pad = 8 + _round_up(max(s, 1), 8)            # mask rows + structure rows
    per_lane = 2 * itemsize * (c_pad + rows_pad)      # double-buffered in + outs
    tp = max(128, (budget // per_lane) // 128 * 128)
    tp = min(tp, 2048, m)
    tp = (tp // 128) * 128
    while m % tp != 0:                                # exact divisor (128 always works)
        tp -= 128
    return tp


def _vmem_limit_bytes(tp, c, s, itemsize):
    cap = _vmem_capacity_bytes()
    c_pad = _round_up(max(c, 1), 8)
    rows_pad = 8 + _round_up(max(s, 1), 8)
    usage = 2 * itemsize * (c_pad + rows_pad) * tp    # double-buffered blocks
    return int(min(cap * 0.85, usage + (16 << 20)))   # + headroom for weights/scratch


# --------------------------------------------------------------------------- #
# Forward
# --------------------------------------------------------------------------- #
@functools.partial(jax.jit, static_argnames=("avg",))
def scl_forward(feature_nchw, w_mask, b_mask, w_str, b_str, *, avg=True):
    """feature_nchw: (N, C, H, W) (PyTorch layout).
    Returns (mask, object_extents, coord_loss, mask_loss, structure_map)."""
    N, C, H, W = feature_nchw.shape
    S = w_str.shape[1]
    dtype = feature_nchw.dtype
    itemsize = jnp.dtype(dtype).itemsize

    # ---- AvgPool2d(2,2): one fused XLA reduce (floor-crops odd H/W like PyTorch)
    if avg:
        H2, W2 = H // 2, W // 2
        pooled = feature_nchw[:, :, : H2 * 2, : W2 * 2]
        pooled = pooled.reshape(N, C, H2, 2, W2, 2).mean(axis=(3, 5))
    else:
        H2, W2 = H, W
        pooled = feature_nchw
    P = H2 * W2

    # TODO(synk): attention == 'CA' / 'CBAM' branches (CA_Block, CBAM undefined).

    # ---- fuse maskg + strutureg 1x1 convs into one (1+S, C) matmul
    w_fused = jnp.concatenate([w_mask, w_str], axis=1).T.astype(dtype)       # (1+S, C)
    b_fused = jnp.concatenate([b_mask.reshape(1, 1), b_str.reshape(1, S)],
                              axis=1).T.astype(jnp.float32)                   # (1+S, 1)

    fold_n = (P < 256) or (P % 128 != 0)

    if fold_n:
        # Small / ragged pixel count (default config: P = 64): fold the batch
        # into the lane axis for >=128-lane store density and a coarser grid.
        # The transpose below touches only the (already 4x reduced) pooled map.
        M = N * P
        x_in = jnp.transpose(pooled.reshape(N, C, P), (1, 0, 2)).reshape(C, M)
        tp = _choose_tp(M, C, S, itemsize)
        if (M // tp) < 2 and tp % 256 == 0:           # give v7x megacore >=2 steps
            tp //= 2
        grid = (M // tp,)
        in_specs = [
            pl.BlockSpec((C, tp), lambda p: (0, p)),
            pl.BlockSpec((1 + S, C), lambda p: (0, 0)),
            pl.BlockSpec((1 + S, 1), lambda p: (0, 0)),
        ]
        out_shape = (jax.ShapeDtypeStruct((1, M), dtype),
                     jax.ShapeDtypeStruct((S, M), dtype))
        out_specs = (pl.BlockSpec((1, tp), lambda p: (0, p)),
                     pl.BlockSpec((S, tp), lambda p: (0, p)))
        dim_sem = ("parallel",)
    else:
        # Large, 128-aligned pixel count: per-sample layout.  No transposes at
        # all -- the kernel outputs reshape straight to NCHW.
        x_in = pooled.reshape(N, C, P)
        tp = _choose_tp(P, C, S, itemsize)
        if N * (P // tp) < 2 and tp % 256 == 0:        # give v7x megacore >=2 steps
            tp //= 2
        grid = (N, P // tp)
        in_specs = [
            pl.BlockSpec((None, C, tp), lambda n, p: (n, 0, p)),
            pl.BlockSpec((1 + S, C), lambda n, p: (0, 0)),
            pl.BlockSpec((1 + S, 1), lambda n, p: (0, 0)),
        ]
        out_shape = (jax.ShapeDtypeStruct((N, 1, P), dtype),
                     jax.ShapeDtypeStruct((N, S, P), dtype))
        out_specs = (pl.BlockSpec((None, 1, tp), lambda n, p: (n, 0, p)),
                     pl.BlockSpec((None, S, tp), lambda n, p: (n, 0, p)))
        dim_sem = ("parallel", "parallel")

    total_lanes = N * P
    cost = pl.CostEstimate(
        flops=2 * (1 + S) * C * total_lanes,
        transcendentals=0,
        bytes_accessed=itemsize * total_lanes * (C + 1 + S) + 4 * (1 + S) * (C + 1),
    )

    mask_flat, str_flat = pl.pallas_call(
        _scl_kernel,
        out_shape=out_shape,
        grid=grid,
        in_specs=in_specs,
        out_specs=out_specs,
        compiler_params=pltpu.CompilerParams(
            dimension_semantics=dim_sem,
            vmem_limit_bytes=_vmem_limit_bytes(tp, C, S, itemsize),
        ),
        cost_estimate=cost,
    )(x_in, w_fused, b_fused)

    if fold_n:
        mask = mask_flat.reshape(N, H2, W2)                       # mask.view(N, H, W)
        structure_map = jnp.transpose(str_flat.reshape(S, N, H2, W2), (1, 0, 2, 3))
    else:
        mask = mask_flat.reshape(N, H2, W2)
        structure_map = str_flat.reshape(N, S, H2, W2)

    # TODO(synk): calc_rela / CoordPredictor are not defined in the reference
    # source; mask_loss / coord_loss / object_extents are placeholders.
    object_extents = mask
    coord_loss = jnp.zeros((), jnp.float32)
    mask_loss = jnp.zeros((), jnp.float32)
    return mask, object_extents, coord_loss, mask_loss, structure_map


# --------------------------------------------------------------------------- #
# Demo / self-check
# --------------------------------------------------------------------------- #
def _init_params(key, feature_dim, structure_dim):
    """Deterministic synthetic parameters (PyTorch Conv2d 1x1 == dense over C)."""
    k1, k2, k3, k4 = jax.random.split(key, 4)
    w_mask = jax.random.normal(k1, (feature_dim, 1), jnp.float32) * 0.1
    b_mask = jax.random.normal(k2, (1, 1), jnp.float32) * 0.1
    w_str = jax.random.normal(k3, (feature_dim, structure_dim), jnp.float32) * 0.1
    b_str = jax.random.normal(k4, (1, structure_dim), jnp.float32) * 0.1
    return w_mask, b_mask, w_str, b_str


def _reference(feature, w_mask, b_mask, w_str, b_str, avg):
    """Plain-JAX reference of the implemented (pool -> ReLU -> 1x1 convs) path."""
    N, C, H, W = feature.shape
    if avg:
        H2, W2 = H // 2, W // 2
        pooled = feature[:, :, : H2 * 2, : W2 * 2]
        pooled = pooled.reshape(N, C, H2, 2, W2, 2).mean(axis=(3, 5))
    else:
        H2, W2 = H, W
        pooled = feature
    r = jnp.maximum(pooled, 0.0)                       # (N, C, H2, W2)
    rt = jnp.transpose(r, (0, 2, 3, 1))                # (N, H2, W2, C)
    mask = (rt @ w_mask + b_mask[0]).reshape(N, H2, W2)
    smap = jnp.maximum(rt @ w_str + b_str[0], 0.0)
    smap = jnp.transpose(smap, (0, 3, 1, 2))           # (N, S, H2, W2)
    return mask, smap


if __name__ == "__main__":
    # SCLModule(size=16, feature_dim=4, structure_dim=8, avg=True, attention='',
    #           num_positive=3, M=0)
    N, C, H, W = 2, 4, 16, 16
    structure_dim = 8

    key = jax.random.PRNGKey(0)
    k_in, k_par = jax.random.split(key)
    feature = jax.random.normal(k_in, (N, C, H, W), jnp.float32)
    w_mask, b_mask, w_str, b_str = _init_params(k_par, C, structure_dim)

    ok = True
    for avg in (True, False):  # exercises both the folded-batch and per-sample paths
        outs = scl_forward(feature, w_mask, b_mask, w_str, b_str, avg=avg)
        outs = jax.block_until_ready(outs)
        mask, object_extents, coord_loss, mask_loss, structure_map = outs

        ref_mask, ref_smap = _reference(feature, w_mask, b_mask, w_str, b_str, avg)
        assert mask.shape == ref_mask.shape
        assert structure_map.shape == ref_smap.shape
        ok = ok and bool(jnp.allclose(mask, ref_mask, atol=1e-5))
        ok = ok and bool(jnp.allclose(structure_map, ref_smap, atol=1e-5))

    if ok:
        print("KERNEL_OK")
    else:
        print("MISMATCH")
</pallas_src>

<mosaic_0001>
module attributes {stable_mosaic.version = 11 : i64} {
  func.func @_scl_kernel(%arg0: i32, %arg1: memref<4x128xf32, #tpu.memory_space<vmem>>, %arg2: memref<9x4xf32, #tpu.memory_space<vmem>>, %arg3: memref<9x1xf32, #tpu.memory_space<vmem>>, %arg4: memref<1x128xf32, #tpu.memory_space<vmem>>, %arg5: memref<8x128xf32, #tpu.memory_space<vmem>>) attributes {dimension_semantics = [#tpu.dimension_semantics<parallel>], iteration_bounds = array<i64: 1>, scalar_prefetch = 0 : i64, scratch_operands = 0 : i64, tpu.core_type = #tpu.core_type<tc>, window_params = [{transform_indices = @transform_0, window_bounds = array<i64: 4, 128>}, {pipeline_mode = #tpu.pipeline_mode<synchronous>, transform_indices = @transform_1, window_bounds = array<i64: 9, 4>}, {pipeline_mode = #tpu.pipeline_mode<synchronous>, transform_indices = @transform_2, window_bounds = array<i64: 9, 1>}, {transform_indices = @transform_3, window_bounds = array<i64: 1, 128>}, {transform_indices = @transform_4, window_bounds = array<i64: 8, 128>}]} {
    %c0 = arith.constant 0 : index
    %c0_0 = arith.constant 0 : index
    %0 = vector.load %arg1[%c0, %c0_0] : memref<4x128xf32, #tpu.memory_space<vmem>>, vector<4x128xf32>
    %cst = arith.constant 0.000000e+00 : f32
    %1 = vector.broadcast %cst : f32 to vector<4x128xf32>
    %2 = arith.maximumf %0, %1 : vector<4x128xf32>
    %c0_1 = arith.constant 0 : index
    %c0_2 = arith.constant 0 : index
    %3 = vector.load %arg2[%c0_1, %c0_2] : memref<9x4xf32, #tpu.memory_space<vmem>>, vector<9x4xf32>
    %cst_3 = arith.constant dense<0.000000e+00> : vector<9x128xf32>
    %4 = tpu.matmul %3, %2, %cst_3 {dimension_numbers = #tpu.dot_dimension_numbers<[1], [0], [0], [1], [0, 0, 1, 1], [], []>} : vector<9x4xf32>, vector<4x128xf32>, vector<9x128xf32> -> vector<9x128xf32>
    %c0_4 = arith.constant 0 : index
    %c0_5 = arith.constant 0 : index
    %5 = vector.load %arg3[%c0_4, %c0_5] : memref<9x1xf32, #tpu.memory_space<vmem>>, vector<9x1xf32>
    %6 = vector.broadcast %5 : vector<9x1xf32> to vector<9x128xf32>
    %7 = arith.addf %4, %6 : vector<9x128xf32>
    %8 = vector.extract_strided_slice %7 {offsets = [0, 0], sizes = [1, 128], strides = [1, 1]} : vector<9x128xf32> to vector<1x128xf32>
    %c0_6 = arith.constant 0 : index
    %c0_7 = arith.constant 0 : index
    %9 = vector.load %arg4[%c0_6, %c0_7] : memref<1x128xf32, #tpu.memory_space<vmem>>, vector<1x128xf32>
    tpu.vector_store %arg4[%c0_6, %c0_7], %8 {strides = array<i32>} : memref<1x128xf32, #tpu.memory_space<vmem>>, vector<1x128xf32>,
    %10 = vector.extract_strided_slice %7 {offsets = [1, 0], sizes = [8, 128], strides = [1, 1]} : vector<9x128xf32> to vector<8x128xf32>
    %cst_8 = arith.constant 0.000000e+00 : f32
    %11 = vector.broadcast %cst_8 : f32 to vector<8x128xf32>
    %12 = arith.maximumf %10, %11 : vector<8x128xf32>
    %c0_9 = arith.constant 0 : index
    %c0_10 = arith.constant 0 : index
    %13 = vector.load %arg5[%c0_9, %c0_10] : memref<8x128xf32, #tpu.memory_space<vmem>>, vector<8x128xf32>
    tpu.vector_store %arg5[%c0_9, %c0_10], %12 {strides = array<i32>} : memref<8x128xf32, #tpu.memory_space<vmem>>, vector<8x128xf32>,
    return
  }
  func.func @transform_0(%arg0: i32) -> (i32, i32) {
    %c0_i32 = arith.constant 0 : i32
    %c0_i32_0 = arith.constant 0 : i32
    return %c0_i32, %arg0 : i32, i32
  }
  func.func @transform_1(%arg0: i32) -> (i32, i32) {
    %c0_i32 = arith.constant 0 : i32
    %c0_i32_0 = arith.constant 0 : i32
    %c0_i32_1 = arith.constant 0 : i32
    return %c0_i32, %c0_i32_0 : i32, i32
  }
  func.func @transform_2(%arg0: i32) -> (i32, i32) {
    %c0_i32 = arith.constant 0 : i32
    %c0_i32_0 = arith.constant 0 : i32
    %c0_i32_1 = arith.constant 0 : i32
    return %c0_i32, %c0_i32_0 : i32, i32
  }
  func.func @transform_3(%arg0: i32) -> (i32, i32) {
    %c0_i32 = arith.constant 0 : i32
    %c0_i32_0 = arith.constant 0 : i32
    return %c0_i32, %arg0 : i32, i32
  }
  func.func @transform_4(%arg0: i32) -> (i32, i32) {
    %c0_i32 = arith.constant 0 : i32
    %c0_i32_0 = arith.constant 0 : i32
    return %c0_i32, %arg0 : i32, i32
  }
}

</mosaic_0001>

<bundles_post_ra>
// kernel: scl_forward.1
= control target key start
LH: loop header
LB: loop body
LE: loop exit
PB: predicated region body
PF: predicated region fallthrough
CT: control target
= control target key end

     0   :  { %vm32_vm0 = vcmask 31744   ;;  %vm39_vm1 = vcmask 1043456   ;;  %v144_v2 = vmov 0   ;;  %s194_s0 = inlined_call_operand.vmem [shape: f32[4,128], index: 0, kind: input, shape index: {}]   ;;  %s195_s1 = inlined_call_operand.vmem [shape: f32[9,4], index: 1, kind: input, shape index: {}]   ;;  %s196_s2 = inlined_call_operand.vmem [shape: f32[9,1], index: 2, kind: input, shape index: {}]   ;;  %s197_s3 = inlined_call_operand.vmem [shape: f32[1,128], index: 3, kind: output, shape index: {0}]   ;;  %s198_s4 = inlined_call_operand.vmem [shape: f32[8,128], index: 4, kind: output, shape index: {1}]  }
   0x1   :  { %v16_v0 = vld [vmem:[%s194_s0] sm:$0xf]  ;;  %143 = vset.pattern.permute.xlu0 %v144_v2  ;;  %v19_v5 = vld [vmem:[%s195_s1 + $0x8] sm:$0x1] }
   0x2   :  { %v18_v1 = vld [vmem:[%s195_s1] sm:$0xff]  ;;  %v17_v3 = vmax.f32 %v16_v0, 0.0  ;;  %v21_v6 = vld [vmem:[%s196_s2 + $0x8] sm:$0x1] }
   0x3   :  { %139 = vmatprep.mubr.msk.f32.mxu0 %vm32_vm0, %v18_v1  ;;  %v20_v4 = vld [vmem:[%s196_s2] sm:$0xff] }
   0x4   :  { %24 = vperm.xlu0 %143, %v20_v4   ;;  %137 = vmatprep.subr.msk.mxu0 %vm39_vm1, %v17_v3 }
   0x5   :  { %138 = vmatpush3.msk.msra.mxu0 %vm39_vm1, %v17_v3 }
   0x6   :  { %140 = vmatmul.mubr.msk.f32.vlgmr.msra.gmra.mrb[0].mxu0 %vm32_vm0, %v19_v5 }
   0x8   :  { %29 = vperm.xlu0 %143, %v21_v6  }
  0x83   :  { %v25_v7 = vpop.permute.xlu0 %24 }
  0x87   :  { %v30_v8 = vpop.permute.xlu0 %29 }
  0xd9   :  { %v141_v9 = vpop.f32.mrb[0].mxu0 }
  0xda   :  { %v115_v10 = vadd.f32 %v141_v9, %v30_v8  ;;  %v109_v11 = vpop.f32.mrb[1].mxu0 }
  0xdb   :  { %v110_v12 = vadd.f32 %v109_v11, %v25_v7 }
  0xdc   :  { %v120_v13 = vmax.f32 %v115_v10, 0.0 }
  0xdd   :  { %118 = vst [vmem:[%s197_s3] sm:$0x1] %v110_v12  ;;  %v119_v14 = vmax.f32 %v110_v12, 0.0 }
  0xde   :  { %122 = vst [vmem:[%s198_s4 + $0x7] sm:$0x1] %v120_v13 }
  0xdf   :  { %121 = vst [vmem:[%s198_s4 - $0x1] sm:$0xfe] %v119_v14 }

</bundles_post_ra>
